<compile_context>
chip_gen: v5e
topology: v5e:2x2
jax: 0.10.0
libtpu: 0.0.40
codegen_flags: <defaults>
</compile_context>

<pallas_src>
import functools

import jax
import jax.numpy as jnp
from jax.experimental import pallas as pl
from jax.experimental.pallas import tpu as pltpu


@functools.lru_cache(maxsize=None)
def _vmem_limit():
    """Per-generation VMEM budget: 64 MiB on v5e/v6e (128 MiB), ~48 MiB on v7x (64 MiB)."""
    cap = 128 * 1024 * 1024
    try:
        cap = int(pltpu.get_tpu_info().vmem_capacity_bytes)
    except Exception:
        pass
    return min(64 * 1024 * 1024, (cap * 3) // 4)


def _compiler_params(dim_sem):
    return pltpu.CompilerParams(dimension_semantics=dim_sem,
                                vmem_limit_bytes=_vmem_limit())


# ----------------------------- Pallas kernels -----------------------------

def _matmul_kernel(x_ref, w_ref, o_ref):
    o_ref[...] = jnp.dot(
        x_ref[...], w_ref[...], preferred_element_type=jnp.float32
    ).astype(o_ref.dtype)


def _matmul_gelu_kernel(x_ref, w_ref, o_ref):
    y = jnp.dot(x_ref[...], w_ref[...], preferred_element_type=jnp.float32)
    # tanh GELU routes through the EUP (own VLIW slot); ~1e-3 from erf GELU.
    o_ref[...] = jax.nn.gelu(y, approximate=True).astype(o_ref.dtype)


def _kv_proj_kernel(x_ref, w_ref, o_ref):
    """Fused RxR / stride-R patch gather + projection for one row tile.

    x_ref: (1, th, R, Wr, R*C)  bf16 tile of x viewed as (B, Hr, R, Wr, R*C)
    w_ref: (R, R*C, 2C)         bf16 weight, rows ordered (u, (v, c))
    o_ref: (1, th*Wr, 2C)       kv tokens for this tile
    """
    _, th, R, Wr, RC = x_ref.shape
    acc = None
    for u in range(R):                                    # static unroll over rows of the RxR window
        # (th, Wr, RC) sub-block; collapse (th, Wr) — layout-preserving when Wr % 16 == 0.
        xu = x_ref[0, :, u, :, :].reshape(th * Wr, RC)
        part = jnp.dot(xu, w_ref[u], preferred_element_type=jnp.float32)
        acc = part if acc is None else acc + part
    o_ref[0] = acc.astype(o_ref.dtype)


def _attention_kernel(q_ref, kv_ref, o_ref, *, heads, dim_head):
    """One batch element, one query tile, all heads (channels are head-major).

    q_ref : (1, tq, C)  bf16 query tile (softmax scale folded into wq)
    kv_ref: (1, M, 2C)  bf16 reduced K|V for this batch (resident across q tiles)
    o_ref : (1, tq, C)  bf16 output tile
    """
    C = heads * dim_head
    q = q_ref[0]          # (tq, C) bf16
    kv = kv_ref[0]        # (M, 2C) bf16

    for h in range(heads):                       # static unroll; per-head result stored immediately
        lo = h * dim_head
        qh = q[:, lo:lo + dim_head]              # (tq, d)
        kh = kv[:, lo:lo + dim_head]             # (M, d)   k = kv[:, :C]
        vh = kv[:, C + lo:C + lo + dim_head]     # (M, d)   v = kv[:, C:]

        # q @ k^T on the MXU without materializing k.T; f32 accumulation.
        sim = jax.lax.dot_general(
            qh, kh, (((1,), (1,)), ((), ())),
            preferred_element_type=jnp.float32)  # (tq, M) f32

        m = jnp.max(sim, axis=-1, keepdims=True)         # softmax stats in f32
        p = jnp.exp(sim - m)
        l = jnp.sum(p, axis=-1, keepdims=True)

        oh = jnp.dot(p.astype(kv.dtype), vh,
                     preferred_element_type=jnp.float32)  # (tq, d) f32
        # Deferred normalization on the small (tq, d) tile; approx reciprocal -> EUP.
        o_ref[0, :, lo:lo + dim_head] = (
            oh * pl.reciprocal(l, approx=True)).astype(o_ref.dtype)


# ----------------------------- Pallas wrappers -----------------------------

def pallas_matmul(x, w, *, gelu=False, out_dtype=None, block_m=1024):
    """Token-tiled (M, K) @ (K, N); weight kept fully resident (N <= 2*dim here)."""
    M, K = x.shape
    K2, N = w.shape
    assert K == K2
    out_dtype = out_dtype or x.dtype
    tm = min(block_m, M)
    kernel = _matmul_gelu_kernel if gelu else _matmul_kernel
    return pl.pallas_call(
        kernel,
        out_shape=jax.ShapeDtypeStruct((M, N), out_dtype),
        grid=(pl.cdiv(M, tm),),
        in_specs=[
            pl.BlockSpec((tm, K), lambda i: (i, 0)),
            pl.BlockSpec((K, N), lambda i: (0, 0)),   # constant index -> weight resident
        ],
        out_specs=pl.BlockSpec((tm, N), lambda i: (i, 0)),
        compiler_params=_compiler_params(("parallel",)),
    )(x, w)


def pallas_kv_proj(x_nhwc, wkv_t, *, reduction_ratio, out_dtype):
    """Fused RxR stride-R conv: kv token (i, j) = sum_u x[b, i*R+u, j*R:(j+1)*R, :] @ wkv_u."""
    B, H, W, C = x_nhwc.shape
    R = reduction_ratio
    Hr, Wr, RC = H // R, W // R, R * C
    N2 = wkv_t.shape[-1]
    x_r = x_nhwc.reshape(B, Hr, R, Wr, RC)        # free reshape (no data movement)
    w_r = wkv_t.reshape(R, RC, N2)                # rows already in (u, (v, c)) order
    bytes_per_row = R * Wr * RC * x_nhwc.dtype.itemsize
    th = max(1, min(Hr, (2 * 1024 * 1024) // max(1, bytes_per_row)))   # ~2 MiB x tile
    return pl.pallas_call(
        _kv_proj_kernel,
        out_shape=jax.ShapeDtypeStruct((B, Hr * Wr, N2), out_dtype),
        grid=(B, pl.cdiv(Hr, th)),
        in_specs=[
            pl.BlockSpec((1, th, R, Wr, RC), lambda b, i: (b, i, 0, 0, 0)),
            pl.BlockSpec((R, RC, N2), lambda b, i: (0, 0, 0)),   # resident weight
        ],
        out_specs=pl.BlockSpec((1, th * Wr, N2), lambda b, i: (b, i, 0)),
        compiler_params=_compiler_params(("parallel", "parallel")),
    )(x_r, w_r)


def pallas_attention(q, kv, *, heads, dim_head, block_q=256):
    """q: (B, N, C) head-major channels, kv: (B, M, 2C). Returns (B, N, C)."""
    B, N, C = q.shape
    _, M, C2 = kv.shape
    tq = min(block_q, N)
    kernel = functools.partial(_attention_kernel, heads=heads, dim_head=dim_head)

    def run(kv_spec):
        return pl.pallas_call(
            kernel,
            out_shape=jax.ShapeDtypeStruct((B, N, C), q.dtype),
            grid=(B, pl.cdiv(N, tq)),
            in_specs=[pl.BlockSpec((1, tq, C), lambda b, qi: (b, qi, 0)), kv_spec],
            out_specs=pl.BlockSpec((1, tq, C), lambda b, qi: (b, qi, 0)),
            # No cross-qi accumulator -> both axes truly parallel (lets v7x shard
            # the q-tile loop across its 2 TensorCores; no effect on v5e/v6e).
            compiler_params=_compiler_params(("parallel", "parallel")),
        )(q, kv)

    kv_idx = lambda b, qi: (b, 0, 0)
    try:
        # KV block index only changes with b: single buffer halves its VMEM cost.
        return run(pl.BlockSpec((1, M, C2), kv_idx, pipeline_mode=pl.Buffered(1)))
    except Exception:
        # pipeline_mode / Buffered(1) unsupported on this jax build -> default buffering.
        return run(pl.BlockSpec((1, M, C2), kv_idx))


# ----------------------------- Forward pass -----------------------------

def efficient_self_attention(x, params, *, heads, reduction_ratio):
    """x: (B, C, H, W) float32 (NCHW, matching PyTorch). Returns (B, C, H, W) float32."""
    B, C, H, W = x.shape
    R = reduction_ratio
    hd = C // heads
    scale = float(hd) ** -0.5
    wq, wkv, wo = params["wq"], params["wkv"], params["wo"]

    # Single NCHW -> NHWC layout move + one bf16 cast shared by the q and kv paths.
    x_bf = jnp.transpose(x, (0, 2, 3, 1)).astype(jnp.bfloat16)          # (B, H, W, C)
    tokens = x_bf.reshape(B * H * W, C)

    # bf16 weights; softmax scale folded into wq (free).
    wq_t = (wq[:, :, 0, 0] * scale).T.astype(jnp.bfloat16)                        # (C, C)
    wkv_t = (jnp.transpose(wkv, (2, 3, 1, 0))                                     # (u, v, c, n)
             .reshape(R * R * C, 2 * C).astype(jnp.bfloat16))
    wo_t = wo[:, :, 0, 0].T.astype(jnp.bfloat16)                                  # (C, C)

    # ---- to_q : 1x1 conv == channel matmul ----
    q = pallas_matmul(tokens, wq_t).reshape(B, H * W, C)                          # (B, N, C) bf16

    # ---- to_kv : RxR conv, stride R; patch gather fused into the kernel ----
    Hr, Wr = H // R, W // R
    if Wr % 16 == 0:
        kv = pallas_kv_proj(x_bf, wkv_t, reduction_ratio=R, out_dtype=jnp.bfloat16)
    else:
        # Fallback: materialize the patch matrix in XLA (extra HBM pass).
        patches = (x_bf.reshape(B, Hr, R, Wr, R, C)
                   .transpose(0, 1, 3, 2, 4, 5)
                   .reshape(B * Hr * Wr, R * R * C))
        kv = pallas_matmul(patches, wkv_t).reshape(B, Hr * Wr, 2 * C)

    # ---- attention: heads handled in-kernel (conv channels are already head-major) ----
    out = pallas_attention(q, kv, heads=heads, dim_head=hd)                       # (B, N, C) bf16

    # ---- to_out : 1x1 conv + GELU (fused epilogue), f32 result ----
    y = pallas_matmul(out.reshape(B * H * W, C), wo_t, gelu=True, out_dtype=jnp.float32)
    return y.reshape(B, H, W, C).transpose(0, 3, 1, 2)                            # back to NCHW


# ----------------------------- Pure-JAX reference -----------------------------

def reference(x, params, *, heads, reduction_ratio):
    R = reduction_ratio
    B, C, H, W = x.shape
    hd = C // heads
    dn = ("NCHW", "OIHW", "NCHW")
    hp = jax.lax.Precision.HIGHEST
    q = jax.lax.conv_general_dilated(x, params["wq"], (1, 1), "VALID",
                                     dimension_numbers=dn, precision=hp)
    kv = jax.lax.conv_general_dilated(x, params["wkv"], (R, R), "VALID",
                                      dimension_numbers=dn, precision=hp)
    k, v = jnp.split(kv, 2, axis=1)

    def rearr(t):
        b, c, hh, ww = t.shape
        return (t.reshape(b, heads, c // heads, hh * ww)
                .transpose(0, 1, 3, 2).reshape(b * heads, hh * ww, c // heads))

    qr, kr, vr = map(rearr, (q, k, v))
    sim = jnp.einsum("bid,bjd->bij", qr, kr, precision=hp) * (float(hd) ** -0.5)
    attn = jax.nn.softmax(sim, axis=-1)
    out = jnp.einsum("bij,bjd->bid", attn, vr, precision=hp)
    out = (out.reshape(B, heads, H * W, hd)
           .transpose(0, 1, 3, 2).reshape(B, C, H, W))
    out = jax.lax.conv_general_dilated(out, params["wo"], (1, 1), "VALID",
                                       dimension_numbers=dn, precision=hp)
    return jax.nn.gelu(out, approximate=False)


# ----------------------------- main -----------------------------

if __name__ == "__main__":
    B, C, H, W = 2, 64, 32, 32
    heads, R = 4, 2

    key = jax.random.PRNGKey(0)
    kx, kq, kkv, ko = jax.random.split(key, 4)
    x = jax.random.normal(kx, (B, C, H, W), jnp.float32)
    params = {
        "wq": jax.random.normal(kq, (C, C, 1, 1), jnp.float32) / jnp.sqrt(C),
        "wkv": jax.random.normal(kkv, (2 * C, C, R, R), jnp.float32) / jnp.sqrt(C * R * R),
        "wo": jax.random.normal(ko, (C, C, 1, 1), jnp.float32) / jnp.sqrt(C),
    }

    y = efficient_self_attention(x, params, heads=heads, reduction_ratio=R)
    y = jax.block_until_ready(y)

    y_ref = reference(x, params, heads=heads, reduction_ratio=R)
    assert y.shape == (B, C, H, W)
    err = float(jnp.max(jnp.abs(y - y_ref)))
    ref_max = float(jnp.max(jnp.abs(y_ref)))
    # bf16 MXU operands -> validate with a max-relative tolerance.
    assert err <= 5e-2 * max(1.0, ref_max), f"max abs err {err} (ref max {ref_max})"

    print("KERNEL_OK")
</pallas_src>

<mosaic_0001>
module attributes {stable_mosaic.version = 11 : i64} {
  func.func @_matmul_kernel(%arg0: i32, %arg1: memref<1024x64xbf16, #tpu.memory_space<vmem>>, %arg2: memref<64x64xbf16, #tpu.memory_space<vmem>>, %arg3: memref<1024x64xbf16, #tpu.memory_space<vmem>>) attributes {dimension_semantics = [#tpu.dimension_semantics<parallel>], iteration_bounds = array<i64: 2>, scalar_prefetch = 0 : i64, scratch_operands = 0 : i64, tpu.core_type = #tpu.core_type<tc>, window_params = [{transform_indices = @transform_0, window_bounds = array<i64: 1024, 64>}, {pipeline_mode = #tpu.pipeline_mode<synchronous>, transform_indices = @transform_1, window_bounds = array<i64: 64, 64>}, {transform_indices = @transform_2, window_bounds = array<i64: 1024, 64>}]} {
    %c0 = arith.constant 0 : index
    %c0_0 = arith.constant 0 : index
    %0 = vector.load %arg1[%c0, %c0_0] : memref<1024x64xbf16, #tpu.memory_space<vmem>>, vector<1024x64xbf16>
    %c0_1 = arith.constant 0 : index
    %c0_2 = arith.constant 0 : index
    %1 = vector.load %arg2[%c0_1, %c0_2] : memref<64x64xbf16, #tpu.memory_space<vmem>>, vector<64x64xbf16>
    %cst = arith.constant dense<0.000000e+00> : vector<1024x64xf32>
    %2 = tpu.matmul %0, %1, %cst {dimension_numbers = #tpu.dot_dimension_numbers<[1], [0], [0], [1], [0, 0, 1, 1], [], []>} : vector<1024x64xbf16>, vector<64x64xbf16>, vector<1024x64xf32> -> vector<1024x64xf32>
    %3 = arith.truncf %2 : vector<1024x64xf32> to vector<1024x64xbf16>
    %c0_3 = arith.constant 0 : index
    %c0_4 = arith.constant 0 : index
    %4 = vector.load %arg3[%c0_3, %c0_4] : memref<1024x64xbf16, #tpu.memory_space<vmem>>, vector<1024x64xbf16>
    tpu.vector_store %arg3[%c0_3, %c0_4], %3 {strides = array<i32>} : memref<1024x64xbf16, #tpu.memory_space<vmem>>, vector<1024x64xbf16>,
    return
  }
  func.func @transform_0(%arg0: i32) -> (i32, i32) {
    %c0_i32 = arith.constant 0 : i32
    %c0_i32_0 = arith.constant 0 : i32
    return %arg0, %c0_i32 : i32, i32
  }
  func.func @transform_1(%arg0: i32) -> (i32, i32) {
    %c0_i32 = arith.constant 0 : i32
    %c0_i32_0 = arith.constant 0 : i32
    %c0_i32_1 = arith.constant 0 : i32
    return %c0_i32, %c0_i32_0 : i32, i32
  }
  func.func @transform_2(%arg0: i32) -> (i32, i32) {
    %c0_i32 = arith.constant 0 : i32
    %c0_i32_0 = arith.constant 0 : i32
    return %arg0, %c0_i32 : i32, i32
  }
}

</mosaic_0001>

<bundles_post_ra>
// kernel: tpu_custom_call.1
= control target key start
LH: loop header
LB: loop body
LE: loop exit
PB: predicated region body
PF: predicated region fallthrough
CT: control target
= control target key end

     0   :  { %s1921_s9 = smov 0   ;;  %s2345_s0 = inlined_call_operand.vmem [shape: bf16[2048,64], index: 0, kind: input, shape index: {}]   ;;  %s2346_s1 = inlined_call_operand.vmem [shape: bf16[64,64], index: 1, kind: input, shape index: {}]   ;;  %s2347_s2 = inlined_call_operand.vmem [shape: bf16[2048,64], index: 2, kind: output, shape index: {}]  }
   0x1 LB: > { %s1463_s10 = sadd.s32 4294967295, %s1904_s9   ;;  %p1467_p0 = scmp.ge.s32.totalorder %s1904_s9, 1  ;;  %s1904_s9 = sphi %s1921_s9, %s12_s9  }
   0x2   : > { %p113_p1 = scmp.lt.s32.totalorder %s1904_s9, 3 }
   0x4   : > { %p114_p2 = pnand %p1467_p0, %p113_p1 }
   0x5   : > { %s1468_s13 = sshll.u32 (!%p114_p2), %s1463_s10, 7 }
   0x6   : > { %117 = sbr.rel (%p114_p2) target bundleno = 412 (0x19c), region = 28  ;;  %p136_p3 = scmp.lt.s32.totalorder (!%p114_p2), %s1468_s13, 255 }
   0xb   : > { %v1877_v0 = vld [vmem:[%s2346_s1 + $0x18] sm:$0xff]  ;;  %v1876_v1 = vld [vmem:[%s2346_s1 + $0x10] sm:$0xff]  ;;  %s2349_s13 = smov (!%p136_p3, %s1468_s13), 255  ;;  %v1875_v2 = vld [vmem:[%s2346_s1 + $0x8] sm:$0xff]  ;;  %vm628_vm0 = vcmask 523264   ;;  %vm1278_vm1 = vcmask 519168  }
   0xc   : > { %825 = vmatpush.bf16.msra.mxu0 %v1877_v0  ;;  %1878 = vmatpush.bf16.msra.mxu1 %v1877_v0  ;;  %s1469_s18 = sshll.u32 %s2349_s13, 2  ;;  %v1874_v3 = vld [vmem:[%s2346_s1] sm:$0xff] }
   0xd   : > { %1879 = vmatpush.bf16.msra.mxu2 %v1877_v0  ;;  %1880 = vmatpush.bf16.msra.mxu3 %v1877_v0  ;;  %s1949_s23 = scalar_lea.vmem %s2345_s0, %s1469_s18  ;;  %s2022_s26 = scalar_lea.vmem %s2347_s2, %s1469_s18 }
   0xe   : > { %v1810_v4 = vld [vmem:[%s1949_s23] sm:$0xff]  ;;  %v1811_v8 = vld [vmem:[%s1949_s23 + $0x8] sm:$0xff]  ;;  %v1812_v12 = vld [vmem:[%s1949_s23 + $0x10] sm:$0xff] }
   0xf   : > { %v1826_v5 = vld [vmem:[%s1949_s23 + $0x80] sm:$0xff]  ;;  %v1827_v9 = vld [vmem:[%s1949_s23 + $0x88] sm:$0xff]  ;;  %v1828_v13 = vld [vmem:[%s1949_s23 + $0x90] sm:$0xff] }
  0x10   : > { %826 = vmatpush.bf16.msra.mxu0 %v1876_v1  ;;  %1881 = vmatpush.bf16.msra.mxu1 %v1876_v1  ;;  %v1842_v6 = vld [vmem:[%s1949_s23 + $0x100] sm:$0xff]  ;;  %v1843_v10 = vld [vmem:[%s1949_s23 + $0x108] sm:$0xff]  ;;  %v1844_v14 = vld [vmem:[%s1949_s23 + $0x110] sm:$0xff] }
  0x11   : > { %1882 = vmatpush.bf16.msra.mxu2 %v1876_v1  ;;  %1883 = vmatpush.bf16.msra.mxu3 %v1876_v1  ;;  %v1858_v7 = vld [vmem:[%s1949_s23 + $0x180] sm:$0xff]  ;;  %v1859_v11 = vld [vmem:[%s1949_s23 + $0x188] sm:$0xff]  ;;  %v1860_v15 = vld [vmem:[%s1949_s23 + $0x190] sm:$0xff] }
  0x12   : > { %v1813_v16 = vld [vmem:[%s1949_s23 + $0x18] sm:$0xff]  ;;  %v1814_v20 = vld [vmem:[%s1949_s23 + $0x20] sm:$0xff]  ;;  %v1815_v24 = vld [vmem:[%s1949_s23 + $0x28] sm:$0xff] }
  0x13   : > { %v1829_v17 = vld [vmem:[%s1949_s23 + $0x98] sm:$0xff]  ;;  %v1830_v21 = vld [vmem:[%s1949_s23 + $0xa0] sm:$0xff]  ;;  %v1831_v25 = vld [vmem:[%s1949_s23 + $0xa8] sm:$0xff] }
  0x14   : > { %827 = vmatpush.bf16.msra.mxu0 %v1875_v2  ;;  %1884 = vmatpush.bf16.msra.mxu1 %v1875_v2  ;;  %v1845_v18 = vld [vmem:[%s1949_s23 + $0x118] sm:$0xff]  ;;  %v1846_v22 = vld [vmem:[%s1949_s23 + $0x120] sm:$0xff]  ;;  %v1847_v26 = vld [vmem:[%s1949_s23 + $0x128] sm:$0xff] }
  0x15   : > { %1885 = vmatpush.bf16.msra.mxu2 %v1875_v2  ;;  %1886 = vmatpush.bf16.msra.mxu3 %v1875_v2  ;;  %v1861_v19 = vld [vmem:[%s1949_s23 + $0x198] sm:$0xff]  ;;  %v1862_v23 = vld [vmem:[%s1949_s23 + $0x1a0] sm:$0xff]  ;;  %v1863_v27 = vld [vmem:[%s1949_s23 + $0x1a8] sm:$0xff] }
  0x16   : > { %v1816_v28 = vld [vmem:[%s1949_s23 + $0x30] sm:$0xff]  ;;  %v1817_v32 = vld [vmem:[%s1949_s23 + $0x38] sm:$0xff]  ;;  %v1818_v36 = vld [vmem:[%s1949_s23 + $0x40] sm:$0xff] }
  0x17   : > { %v1832_v29 = vld [vmem:[%s1949_s23 + $0xb0] sm:$0xff]  ;;  %v1833_v33 = vld [vmem:[%s1949_s23 + $0xb8] sm:$0xff]  ;;  %v1834_v37 = vld [vmem:[%s1949_s23 + $0xc0] sm:$0xff] }
  0x18   : > { %828 = vmatpush.bf16.msra.mxu0 %v1874_v3  ;;  %1887 = vmatpush.bf16.msra.mxu1 %v1874_v3  ;;  %v1848_v30 = vld [vmem:[%s1949_s23 + $0x130] sm:$0xff]  ;;  %v1849_v34 = vld [vmem:[%s1949_s23 + $0x138] sm:$0xff]  ;;  %v1850_v40 = vld [vmem:[%s1949_s23 + $0x140] sm:$0xff] }
  0x19   : > { %1888 = vmatpush.bf16.msra.mxu2 %v1874_v3  ;;  %1889 = vmatpush.bf16.msra.mxu3 %v1874_v3  ;;  %v1864_v31 = vld [vmem:[%s1949_s23 + $0x1b0] sm:$0xff]  ;;  %v1865_v35 = vld [vmem:[%s1949_s23 + $0x1b8] sm:$0xff]  ;;  %v1866_v41 = vld [vmem:[%s1949_s23 + $0x1c0] sm:$0xff] }
  0x1a   : > { %v1819_v54 = vld [vmem:[%s1949_s23 + $0x48] sm:$0xff] }
  0x1b   : > { %1744 = vmatmul.msk.bf16.vlgmr.msra.gmra.mxu0 %vm628_vm0, %v1810_v4  ;;  %1760 = vmatmul.msk.bf16.vlgmr.msra.gmra.mxu1 %vm628_vm0, %v1826_v5  ;;  %v1835_v55 = vld [vmem:[%s1949_s23 + $0xc8] sm:$0xff] }
  0x1c   : > { %1776 = vmatmul.msk.bf16.vlgmr.msra.gmra.mxu2 %vm628_vm0, %v1842_v6  ;;  %1792 = vmatmul.msk.bf16.vlgmr.msra.gmra.mxu3 %vm628_vm0, %v1858_v7  ;;  %v1851_v60 = vld [vmem:[%s1949_s23 + $0x148] sm:$0xff] }
  0x1d   : > { %v1867_v61 = vld [vmem:[%s1949_s23 + $0x1c8] sm:$0xff] }
  0x2b   : > { %1745 = vmatmul.msk.bf16.gmra.mxu0 %vm628_vm0, %v1811_v8  ;;  %1761 = vmatmul.msk.bf16.gmra.mxu1 %vm628_vm0, %v1827_v9 }
  0x2c   : > { %1777 = vmatmul.msk.bf16.gmra.mxu2 %vm628_vm0, %v1843_v10  ;;  %1793 = vmatmul.msk.bf16.gmra.mxu3 %vm628_vm0, %v1859_v11  ;;  %v1820_v10 = vld [vmem:[%s1949_s23 + $0x50] sm:$0xff] }
  0x2d   : > { %v1836_v11 = vld [vmem:[%s1949_s23 + $0xd0] sm:$0xff] }
  0x3b   : > { %1746 = vmatmul.msk.bf16.gmra.mxu0 %vm628_vm0, %v1812_v12  ;;  %1762 = vmatmul.msk.bf16.gmra.mxu1 %vm628_vm0, %v1828_v13 }
  0x3c   : > { %1778 = vmatmul.msk.bf16.gmra.mxu2 %vm628_vm0, %v1844_v14  ;;  %1794 = vmatmul.msk.bf16.gmra.mxu3 %vm628_vm0, %v1860_v15 }
  0x4b   : > { %1747 = vmatmul.msk.bf16.gmra.mxu0 %vm628_vm0, %v1813_v16  ;;  %1763 = vmatmul.msk.bf16.gmra.mxu1 %vm628_vm0, %v1829_v17  ;;  %v1852_v16 = vld [vmem:[%s1949_s23 + $0x150] sm:$0xff] }
  0x4c   : > { %1779 = vmatmul.msk.bf16.gmra.mxu2 %vm628_vm0, %v1845_v18  ;;  %1795 = vmatmul.msk.bf16.gmra.mxu3 %vm628_vm0, %v1861_v19  ;;  %v1868_v17 = vld [vmem:[%s1949_s23 + $0x1d0] sm:$0xff] }
  0x5b   : > { %1748 = vmatmul.msk.bf16.gmra.mxu0 %vm628_vm0, %v1814_v20  ;;  %1764 = vmatmul.msk.bf16.gmra.mxu1 %vm628_vm0, %v1830_v21 }
  0x5c   : > { %1780 = vmatmul.msk.bf16.gmra.mxu2 %vm628_vm0, %v1846_v22  ;;  %1796 = vmatmul.msk.bf16.gmra.mxu3 %vm628_vm0, %v1862_v23 }
  0x6b   : > { %1749 = vmatmul.msk.bf16.gmra.mxu0 %vm628_vm0, %v1815_v24  ;;  %1765 = vmatmul.msk.bf16.gmra.mxu1 %vm628_vm0, %v1831_v25 }
  0x6c   : > { %1781 = vmatmul.msk.bf16.gmra.mxu2 %vm628_vm0, %v1847_v26  ;;  %1797 = vmatmul.msk.bf16.gmra.mxu3 %vm628_vm0, %v1863_v27 }
  0x7b   : > { %1750 = vmatmul.msk.bf16.gmra.mxu0 %vm628_vm0, %v1816_v28  ;;  %1766 = vmatmul.msk.bf16.gmra.mxu1 %vm628_vm0, %v1832_v29 }
  0x7c   : > { %1782 = vmatmul.msk.bf16.gmra.mxu2 %vm628_vm0, %v1848_v30  ;;  %1798 = vmatmul.msk.bf16.gmra.mxu3 %vm628_vm0, %v1864_v31  ;;  %v1821_v30 = vld [vmem:[%s1949_s23 + $0x58] sm:$0xff] }
  0x7d   : > { %v1837_v31 = vld [vmem:[%s1949_s23 + $0xd8] sm:$0xff] }
  0x8b   : > { %1751 = vmatmul.msk.bf16.gmra.mxu0 %vm628_vm0, %v1817_v32  ;;  %1767 = vmatmul.msk.bf16.gmra.mxu1 %vm628_vm0, %v1833_v33 }
  0x8c   : > { %1783 = vmatmul.msk.bf16.gmra.mxu2 %vm628_vm0, %v1849_v34  ;;  %1799 = vmatmul.msk.bf16.gmra.mxu3 %vm628_vm0, %v1865_v35 }
  0x98   : > { %v830_v38 = vpop.f32.mrf.mxu0  ;;  %v910_v39 = vpop.f32.mrf.mxu1 }
  0x99   : > { %v1150_v42 = vpack.c.bf16 %v830_v38, %v830_v38  ;;  %v1182_v43 = vpack.c.bf16 %v910_v39, %v910_v39 }
  0x9b   : > { %1279 = vst.msk [vmem:[%s2022_s26] sm:$0xf] %vm1278_vm1, %v1150_v42  ;;  %1752 = vmatmul.msk.bf16.gmra.mxu0 %vm628_vm0, %v1818_v36  ;;  %1768 = vmatmul.msk.bf16.gmra.mxu1 %vm628_vm0, %v1834_v37  ;;  %v1853_v36 = vld [vmem:[%s1949_s23 + $0x158] sm:$0xff] }
  0x9c   : > { %1311 = vst.msk [vmem:[%s2022_s26 + $0x80] sm:$0xf] %vm1278_vm1, %v1182_v43  ;;  %1784 = vmatmul.msk.bf16.gmra.mxu2 %vm628_vm0, %v1850_v40  ;;  %1800 = vmatmul.msk.bf16.gmra.mxu3 %vm628_vm0, %v1866_v41  ;;  %v1869_v37 = vld [vmem:[%s1949_s23 + $0x1d8] sm:$0xff] }
  0x9f   : > { %v990_v44 = vpop.f32.mrf.mxu2  ;;  %v1070_v45 = vpop.f32.mrf.mxu3 }
  0xa0   : > { %v1214_v46 = vpack.c.bf16 %v990_v44, %v990_v44  ;;  %v1246_v47 = vpack.c.bf16 %v1070_v45, %v1070_v45  ;;  %v832_v48 = vpop.f32.mrf.mxu0  ;;  %v912_v49 = vpop.f32.mrf.mxu1 }
  0xa1   : > { %v1151_v50 = vpack.c.bf16 %v832_v48, %v832_v48  ;;  %v1183_v51 = vpack.c.bf16 %v912_v49, %v912_v49 }
  0xa2   : > { %1343 = vst.msk [vmem:[%s2022_s26 + $0x100] sm:$0xf] %vm1278_vm1, %v1214_v46 }
  0xa3   : > { %1375 = vst.msk [vmem:[%s2022_s26 + $0x180] sm:$0xf] %vm1278_vm1, %v1246_v47 }
  0xa4   : > { %1280 = vst.msk [vmem:[%s2022_s26 + $0x4] sm:$0xf] %vm1278_vm1, %v1151_v50  ;;  %v1822_v50 = vld [vmem:[%s1949_s23 + $0x60] sm:$0xff] }
  0xa5   : > { %1312 = vst.msk [vmem:[%s2022_s26 + $0x84] sm:$0xf] %vm1278_vm1, %v1183_v51  ;;  %v1838_v51 = vld [vmem:[%s1949_s23 + $0xe0] sm:$0xff] }
  0xa7   : > { %v992_v52 = vpop.f32.mrf.mxu2  ;;  %v1072_v53 = vpop.f32.mrf.mxu3 }
  0xa8   : > { %v1215_v56 = vpack.c.bf16 %v992_v52, %v992_v52  ;;  %v1247_v57 = vpack.c.bf16 %v1072_v53, %v1072_v53  ;;  %v835_v58 = vpop.f32.mrf.mxu0  ;;  %v915_v59 = vpop.f32.mrf.mxu1 }
  0xa9   : > { %v1152_v62 = vpack.c.bf16 %v835_v58, %v835_v58  ;;  %v1184_v63 = vpack.c.bf16 %v915_v59, %v915_v59 }
  0xaa   : > { %1344 = vst.msk [vmem:[%s2022_s26 + $0x104] sm:$0xf] %vm1278_vm1, %v1215_v56  ;;  %v1854_v56 = vld [vmem:[%s1949_s23 + $0x160] sm:$0xff] }
  0xab   : > { %1376 = vst.msk [vmem:[%s2022_s26 + $0x184] sm:$0xf] %vm1278_vm1, %v1247_v57  ;;  %1753 = vmatmul.msk.bf16.gmra.mxu0 %vm628_vm0, %v1819_v54  ;;  %1769 = vmatmul.msk.bf16.gmra.mxu1 %vm628_vm0, %v1835_v55  ;;  %v1870_v57 = vld [vmem:[%s1949_s23 + $0x1e0] sm:$0xff] }
  0xac   : > { %1281 = vst.msk [vmem:[%s2022_s26 + $0x8] sm:$0xf] %vm1278_vm1, %v1152_v62  ;;  %1785 = vmatmul.msk.bf16.gmra.mxu2 %vm628_vm0, %v1851_v60  ;;  %1801 = vmatmul.msk.bf16.gmra.mxu3 %vm628_vm0, %v1867_v61 }
  0xad   : > { %1313 = vst.msk [vmem:[%s2022_s26 + $0x88] sm:$0xf] %vm1278_vm1, %v1184_v63 }
  0xaf   : > { %v995_v0 = vpop.f32.mrf.mxu2  ;;  %v1075_v1 = vpop.f32.mrf.mxu3 }
  0xb0   : > { %v1216_v2 = vpack.c.bf16 %v995_v0, %v995_v0  ;;  %v1248_v3 = vpack.c.bf16 %v1075_v1, %v1075_v1  ;;  %v837_v4 = vpop.f32.mrf.mxu0  ;;  %v917_v5 = vpop.f32.mrf.mxu1 }
  0xb1   : > { %v1153_v6 = vpack.c.bf16 %v837_v4, %v837_v4  ;;  %v1185_v7 = vpack.c.bf16 %v917_v5, %v917_v5 }
  0xb2   : > { %1345 = vst.msk [vmem:[%s2022_s26 + $0x108] sm:$0xf] %vm1278_vm1, %v1216_v2 }
  0xb3   : > { %1377 = vst.msk [vmem:[%s2022_s26 + $0x188] sm:$0xf] %vm1278_vm1, %v1248_v3 }
  0xb4   : > { %1282 = vst.msk [vmem:[%s2022_s26 + $0xc] sm:$0xf] %vm1278_vm1, %v1153_v6  ;;  %v1823_v6 = vld [vmem:[%s1949_s23 + $0x68] sm:$0xff] }
  0xb5   : > { %1314 = vst.msk [vmem:[%s2022_s26 + $0x8c] sm:$0xf] %vm1278_vm1, %v1185_v7  ;;  %v1839_v7 = vld [vmem:[%s1949_s23 + $0xe8] sm:$0xff] }
  0xb7   : > { %v997_v8 = vpop.f32.mrf.mxu2  ;;  %v1077_v9 = vpop.f32.mrf.mxu3 }
  0xb8   : > { %v1217_v12 = vpack.c.bf16 %v997_v8, %v997_v8  ;;  %v1249_v13 = vpack.c.bf16 %v1077_v9, %v1077_v9  ;;  %v840_v14 = vpop.f32.mrf.mxu0  ;;  %v920_v15 = vpop.f32.mrf.mxu1 }
  0xb9   : > { %v1154_v18 = vpack.c.bf16 %v840_v14, %v840_v14  ;;  %v1186_v19 = vpack.c.bf16 %v920_v15, %v920_v15 }
  0xba   : > { %1346 = vst.msk [vmem:[%s2022_s26 + $0x10c] sm:$0xf] %vm1278_vm1, %v1217_v12  ;;  %v1855_v12 = vld [vmem:[%s1949_s23 + $0x168] sm:$0xff] }
  0xbb   : > { %1378 = vst.msk [vmem:[%s2022_s26 + $0x18c] sm:$0xf] %vm1278_vm1, %v1249_v13  ;;  %1754 = vmatmul.msk.bf16.gmra.mxu0 %vm628_vm0, %v1820_v10  ;;  %1770 = vmatmul.msk.bf16.gmra.mxu1 %vm628_vm0, %v1836_v11  ;;  %v1871_v13 = vld [vmem:[%s1949_s23 + $0x1e8] sm:$0xff] }
  0xbc   : > { %1283 = vst.msk [vmem:[%s2022_s26 + $0x10] sm:$0xf] %vm1278_vm1, %v1154_v18  ;;  %1786 = vmatmul.msk.bf16.gmra.mxu2 %vm628_vm0, %v1852_v16  ;;  %1802 = vmatmul.msk.bf16.gmra.mxu3 %vm628_vm0, %v1868_v17 }
  0xbd   : > { %1315 = vst.msk [vmem:[%s2022_s26 + $0x90] sm:$0xf] %vm1278_vm1, %v1186_v19 }
  0xbf   : > { %v1000_v20 = vpop.f32.mrf.mxu2  ;;  %v1080_v21 = vpop.f32.mrf.mxu3 }
  0xc0   : > { %v1218_v22 = vpack.c.bf16 %v1000_v20, %v1000_v20  ;;  %v1250_v23 = vpack.c.bf16 %v1080_v21, %v1080_v21  ;;  %v842_v24 = vpop.f32.mrf.mxu0  ;;  %v922_v25 = vpop.f32.mrf.mxu1 }
  0xc1   : > { %v1155_v26 = vpack.c.bf16 %v842_v24, %v842_v24  ;;  %v1187_v27 = vpack.c.bf16 %v922_v25, %v922_v25 }
  0xc2   : > { %1347 = vst.msk [vmem:[%s2022_s26 + $0x110] sm:$0xf] %vm1278_vm1, %v1218_v22 }
  0xc3   : > { %1379 = vst.msk [vmem:[%s2022_s26 + $0x190] sm:$0xf] %vm1278_vm1, %v1250_v23 }
  0xc4   : > { %1284 = vst.msk [vmem:[%s2022_s26 + $0x14] sm:$0xf] %vm1278_vm1, %v1155_v26  ;;  %v1824_v26 = vld [vmem:[%s1949_s23 + $0x70] sm:$0xff] }
  0xc5   : > { %1316 = vst.msk [vmem:[%s2022_s26 + $0x94] sm:$0xf] %vm1278_vm1, %v1187_v27  ;;  %v1840_v27 = vld [vmem:[%s1949_s23 + $0xf0] sm:$0xff] }
  0xc7   : > { %v1002_v28 = vpop.f32.mrf.mxu2  ;;  %v1082_v29 = vpop.f32.mrf.mxu3 }
  0xc8   : > { %v1219_v32 = vpack.c.bf16 %v1002_v28, %v1002_v28  ;;  %v1251_v33 = vpack.c.bf16 %v1082_v29, %v1082_v29  ;;  %v845_v34 = vpop.f32.mrf.mxu0  ;;  %v925_v35 = vpop.f32.mrf.mxu1 }
  0xc9   : > { %v1156_v38 = vpack.c.bf16 %v845_v34, %v845_v34  ;;  %v1188_v39 = vpack.c.bf16 %v925_v35, %v925_v35 }
  0xca   : > { %1348 = vst.msk [vmem:[%s2022_s26 + $0x114] sm:$0xf] %vm1278_vm1, %v1219_v32  ;;  %v1856_v32 = vld [vmem:[%s1949_s23 + $0x170] sm:$0xff] }
  0xcb   : > { %1380 = vst.msk [vmem:[%s2022_s26 + $0x194] sm:$0xf] %vm1278_vm1, %v1251_v33  ;;  %1755 = vmatmul.msk.bf16.gmra.mxu0 %vm628_vm0, %v1821_v30  ;;  %1771 = vmatmul.msk.bf16.gmra.mxu1 %vm628_vm0, %v1837_v31  ;;  %v1872_v33 = vld [vmem:[%s1949_s23 + $0x1f0] sm:$0xff] }
  0xcc   : > { %1285 = vst.msk [vmem:[%s2022_s26 + $0x18] sm:$0xf] %vm1278_vm1, %v1156_v38  ;;  %1787 = vmatmul.msk.bf16.gmra.mxu2 %vm628_vm0, %v1853_v36  ;;  %1803 = vmatmul.msk.bf16.gmra.mxu3 %vm628_vm0, %v1869_v37 }
  0xcd   : > { %1317 = vst.msk [vmem:[%s2022_s26 + $0x98] sm:$0xf] %vm1278_vm1, %v1188_v39 }
  0xcf   : > { %v1005_v40 = vpop.f32.mrf.mxu2  ;;  %v1085_v41 = vpop.f32.mrf.mxu3 }
  0xd0   : > { %v1220_v42 = vpack.c.bf16 %v1005_v40, %v1005_v40  ;;  %v1252_v43 = vpack.c.bf16 %v1085_v41, %v1085_v41  ;;  %v847_v44 = vpop.f32.mrf.mxu0  ;;  %v927_v45 = vpop.f32.mrf.mxu1 }
  0xd1   : > { %v1157_v46 = vpack.c.bf16 %v847_v44, %v847_v44  ;;  %v1189_v47 = vpack.c.bf16 %v927_v45, %v927_v45 }
  0xd2   : > { %1349 = vst.msk [vmem:[%s2022_s26 + $0x118] sm:$0xf] %vm1278_vm1, %v1220_v42 }
  0xd3   : > { %1381 = vst.msk [vmem:[%s2022_s26 + $0x198] sm:$0xf] %vm1278_vm1, %v1252_v43 }
  0xd4   : > { %1286 = vst.msk [vmem:[%s2022_s26 + $0x1c] sm:$0xf] %vm1278_vm1, %v1157_v46  ;;  %v1825_v46 = vld [vmem:[%s1949_s23 + $0x78] sm:$0xff] }
  0xd5   : > { %1318 = vst.msk [vmem:[%s2022_s26 + $0x9c] sm:$0xf] %vm1278_vm1, %v1189_v47  ;;  %v1841_v47 = vld [vmem:[%s1949_s23 + $0xf8] sm:$0xff] }
  0xd7   : > { %v1007_v48 = vpop.f32.mrf.mxu2  ;;  %v1087_v49 = vpop.f32.mrf.mxu3 }
  0xd8   : > { %v1221_v52 = vpack.c.bf16 %v1007_v48, %v1007_v48  ;;  %v1253_v53 = vpack.c.bf16 %v1087_v49, %v1087_v49  ;;  %v850_v54 = vpop.f32.mrf.mxu0  ;;  %v930_v55 = vpop.f32.mrf.mxu1 }
  0xd9   : > { %v1158_v58 = vpack.c.bf16 %v850_v54, %v850_v54  ;;  %v1190_v59 = vpack.c.bf16 %v930_v55, %v930_v55 }
  0xda   : > { %1350 = vst.msk [vmem:[%s2022_s26 + $0x11c] sm:$0xf] %vm1278_vm1, %v1221_v52  ;;  %v1857_v52 = vld [vmem:[%s1949_s23 + $0x178] sm:$0xff] }
  0xdb   : > { %1382 = vst.msk [vmem:[%s2022_s26 + $0x19c] sm:$0xf] %vm1278_vm1, %v1253_v53  ;;  %1756 = vmatmul.msk.bf16.gmra.mxu0 %vm628_vm0, %v1822_v50  ;;  %1772 = vmatmul.msk.bf16.gmra.mxu1 %vm628_vm0, %v1838_v51  ;;  %v1873_v53 = vld [vmem:[%s1949_s23 + $0x1f8] sm:$0xff] }
  0xdc   : > { %1287 = vst.msk [vmem:[%s2022_s26 + $0x20] sm:$0xf] %vm1278_vm1, %v1158_v58  ;;  %1788 = vmatmul.msk.bf16.gmra.mxu2 %vm628_vm0, %v1854_v56  ;;  %1804 = vmatmul.msk.bf16.gmra.mxu3 %vm628_vm0, %v1870_v57 }
  0xdd   : > { %1319 = vst.msk [vmem:[%s2022_s26 + $0xa0] sm:$0xf] %vm1278_vm1, %v1190_v59 }
  0xdf   : > { %v1010_v60 = vpop.f32.mrf.mxu2  ;;  %v1090_v61 = vpop.f32.mrf.mxu3 }
  0xe0   : > { %v1222_v62 = vpack.c.bf16 %v1010_v60, %v1010_v60  ;;  %v1254_v63 = vpack.c.bf16 %v1090_v61, %v1090_v61  ;;  %v852_v0 = vpop.f32.mrf.mxu0  ;;  %v932_v1 = vpop.f32.mrf.mxu1 }
  0xe1   : > { %v1159_v2 = vpack.c.bf16 %v852_v0, %v852_v0  ;;  %v1191_v3 = vpack.c.bf16 %v932_v1, %v932_v1 }
  0xe2   : > { %1351 = vst.msk [vmem:[%s2022_s26 + $0x120] sm:$0xf] %vm1278_vm1, %v1222_v62 }
  0xe3   : > { %1383 = vst.msk [vmem:[%s2022_s26 + $0x1a0] sm:$0xf] %vm1278_vm1, %v1254_v63 }
  0xe4   : > { %1288 = vst.msk [vmem:[%s2022_s26 + $0x24] sm:$0xf] %vm1278_vm1, %v1159_v2 }
  0xe5   : > { %1320 = vst.msk [vmem:[%s2022_s26 + $0xa4] sm:$0xf] %vm1278_vm1, %v1191_v3 }
  0xe7   : > { %v1012_v4 = vpop.f32.mrf.mxu2  ;;  %v1092_v5 = vpop.f32.mrf.mxu3 }
  0xe8   : > { %v1223_v8 = vpack.c.bf16 %v1012_v4, %v1012_v4  ;;  %v1255_v9 = vpack.c.bf16 %v1092_v5, %v1092_v5  ;;  %v855_v10 = vpop.f32.mrf.mxu0  ;;  %v935_v11 = vpop.f32.mrf.mxu1 }
  0xe9   : > { %v1160_v14 = vpack.c.bf16 %v855_v10, %v855_v10  ;;  %v1192_v15 = vpack.c.bf16 %v935_v11, %v935_v11 }
  0xea   : > { %1352 = vst.msk [vmem:[%s2022_s26 + $0x124] sm:$0xf] %vm1278_vm1, %v1223_v8 }
  0xeb   : > { %1384 = vst.msk [vmem:[%s2022_s26 + $0x1a4] sm:$0xf] %vm1278_vm1, %v1255_v9  ;;  %1757 = vmatmul.msk.bf16.gmra.mxu0 %vm628_vm0, %v1823_v6  ;;  %1773 = vmatmul.msk.bf16.gmra.mxu1 %vm628_vm0, %v1839_v7 }
  0xec   : > { %1289 = vst.msk [vmem:[%s2022_s26 + $0x28] sm:$0xf] %vm1278_vm1, %v1160_v14  ;;  %1789 = vmatmul.msk.bf16.gmra.mxu2 %vm628_vm0, %v1855_v12  ;;  %1805 = vmatmul.msk.bf16.gmra.mxu3 %vm628_vm0, %v1871_v13 }
  0xed   : > { %1321 = vst.msk [vmem:[%s2022_s26 + $0xa8] sm:$0xf] %vm1278_vm1, %v1192_v15 }
  0xef   : > { %v1015_v16 = vpop.f32.mrf.mxu2  ;;  %v1095_v17 = vpop.f32.mrf.mxu3 }
  0xf0   : > { %v1224_v18 = vpack.c.bf16 %v1015_v16, %v1015_v16  ;;  %v1256_v19 = vpack.c.bf16 %v1095_v17, %v1095_v17  ;;  %v857_v20 = vpop.f32.mrf.mxu0  ;;  %v937_v21 = vpop.f32.mrf.mxu1 }
  0xf1   : > { %v1161_v22 = vpack.c.bf16 %v857_v20, %v857_v20  ;;  %v1193_v23 = vpack.c.bf16 %v937_v21, %v937_v21 }
  0xf2   : > { %1353 = vst.msk [vmem:[%s2022_s26 + $0x128] sm:$0xf] %vm1278_vm1, %v1224_v18 }
  0xf3   : > { %1385 = vst.msk [vmem:[%s2022_s26 + $0x1a8] sm:$0xf] %vm1278_vm1, %v1256_v19 }
  0xf4   : > { %1290 = vst.msk [vmem:[%s2022_s26 + $0x2c] sm:$0xf] %vm1278_vm1, %v1161_v22 }
  0xf5   : > { %1322 = vst.msk [vmem:[%s2022_s26 + $0xac] sm:$0xf] %vm1278_vm1, %v1193_v23 }
  0xf7   : > { %v1017_v24 = vpop.f32.mrf.mxu2  ;;  %v1097_v25 = vpop.f32.mrf.mxu3 }
  0xf8   : > { %v1225_v28 = vpack.c.bf16 %v1017_v24, %v1017_v24  ;;  %v1257_v29 = vpack.c.bf16 %v1097_v25, %v1097_v25  ;;  %v860_v30 = vpop.f32.mrf.mxu0  ;;  %v940_v31 = vpop.f32.mrf.mxu1 }
  0xf9   : > { %v1162_v34 = vpack.c.bf16 %v860_v30, %v860_v30  ;;  %v1194_v35 = vpack.c.bf16 %v940_v31, %v940_v31 }
  0xfa   : > { %1354 = vst.msk [vmem:[%s2022_s26 + $0x12c] sm:$0xf] %vm1278_vm1, %v1225_v28 }
  0xfb   : > { %1386 = vst.msk [vmem:[%s2022_s26 + $0x1ac] sm:$0xf] %vm1278_vm1, %v1257_v29  ;;  %1758 = vmatmul.msk.bf16.gmra.mxu0 %vm628_vm0, %v1824_v26  ;;  %1774 = vmatmul.msk.bf16.gmra.mxu1 %vm628_vm0, %v1840_v27 }
  0xfc   : > { %1291 = vst.msk [vmem:[%s2022_s26 + $0x30] sm:$0xf] %vm1278_vm1, %v1162_v34  ;;  %1790 = vmatmul.msk.bf16.gmra.mxu2 %vm628_vm0, %v1856_v32  ;;  %1806 = vmatmul.msk.bf16.gmra.mxu3 %vm628_vm0, %v1872_v33 }
  0xfd   : > { %1323 = vst.msk [vmem:[%s2022_s26 + $0xb0] sm:$0xf] %vm1278_vm1, %v1194_v35 }
  0xff   : > { %v1020_v36 = vpop.f32.mrf.mxu2  ;;  %v1100_v37 = vpop.f32.mrf.mxu3 }
 0x100   : > { %v1226_v38 = vpack.c.bf16 %v1020_v36, %v1020_v36  ;;  %v1258_v39 = vpack.c.bf16 %v1100_v37, %v1100_v37  ;;  %v862_v40 = vpop.f32.mrf.mxu0  ;;  %v942_v41 = vpop.f32.mrf.mxu1 }
 0x101   : > { %v1163_v42 = vpack.c.bf16 %v862_v40, %v862_v40  ;;  %v1195_v43 = vpack.c.bf16 %v942_v41, %v942_v41 }
 0x102   : > { %1355 = vst.msk [vmem:[%s2022_s26 + $0x130] sm:$0xf] %vm1278_vm1, %v1226_v38 }
 0x103   : > { %1387 = vst.msk [vmem:[%s2022_s26 + $0x1b0] sm:$0xf] %vm1278_vm1, %v1258_v39 }
 0x104   : > { %1292 = vst.msk [vmem:[%s2022_s26 + $0x34] sm:$0xf] %vm1278_vm1, %v1163_v42 }
 0x105   : > { %1324 = vst.msk [vmem:[%s2022_s26 + $0xb4] sm:$0xf] %vm1278_vm1, %v1195_v43 }
 0x107   : > { %v1022_v44 = vpop.f32.mrf.mxu2  ;;  %v1102_v45 = vpop.f32.mrf.mxu3 }
 0x108   : > { %v1227_v48 = vpack.c.bf16 %v1022_v44, %v1022_v44  ;;  %v1259_v49 = vpack.c.bf16 %v1102_v45, %v1102_v45  ;;  %v865_v50 = vpop.f32.mrf.mxu0  ;;  %v945_v51 = vpop.f32.mrf.mxu1 }
 0x109   : > { %v1164_v54 = vpack.c.bf16 %v865_v50, %v865_v50  ;;  %v1196_v55 = vpack.c.bf16 %v945_v51, %v945_v51 }
 0x10a   : > { %1356 = vst.msk [vmem:[%s2022_s26 + $0x134] sm:$0xf] %vm1278_vm1, %v1227_v48 }
 0x10b   : > { %1388 = vst.msk [vmem:[%s2022_s26 + $0x1b4] sm:$0xf] %vm1278_vm1, %v1259_v49  ;;  %1759 = vmatmul.msk.bf16.gmra.mxu0 %vm628_vm0, %v1825_v46  ;;  %1775 = vmatmul.msk.bf16.gmra.mxu1 %vm628_vm0, %v1841_v47 }
 0x10c   : > { %1293 = vst.msk [vmem:[%s2022_s26 + $0x38] sm:$0xf] %vm1278_vm1, %v1164_v54  ;;  %1791 = vmatmul.msk.bf16.gmra.mxu2 %vm628_vm0, %v1857_v52  ;;  %1807 = vmatmul.msk.bf16.gmra.mxu3 %vm628_vm0, %v1873_v53 }
 0x10d   : > { %1325 = vst.msk [vmem:[%s2022_s26 + $0xb8] sm:$0xf] %vm1278_vm1, %v1196_v55 }
 0x10f   : > { %v1025_v56 = vpop.f32.mrf.mxu2  ;;  %v1105_v57 = vpop.f32.mrf.mxu3 }
 0x110   : > { %v1228_v58 = vpack.c.bf16 %v1025_v56, %v1025_v56  ;;  %v1260_v59 = vpack.c.bf16 %v1105_v57, %v1105_v57  ;;  %v867_v60 = vpop.f32.mrf.mxu0  ;;  %v947_v61 = vpop.f32.mrf.mxu1 }
 0x111   : > { %v1165_v62 = vpack.c.bf16 %v867_v60, %v867_v60  ;;  %v1197_v63 = vpack.c.bf16 %v947_v61, %v947_v61 }
 0x112   : > { %1357 = vst.msk [vmem:[%s2022_s26 + $0x138] sm:$0xf] %vm1278_vm1, %v1228_v58 }
 0x113   : > { %1389 = vst.msk [vmem:[%s2022_s26 + $0x1b8] sm:$0xf] %vm1278_vm1, %v1260_v59 }
 0x114   : > { %1294 = vst.msk [vmem:[%s2022_s26 + $0x3c] sm:$0xf] %vm1278_vm1, %v1165_v62 }
 0x115   : > { %1326 = vst.msk [vmem:[%s2022_s26 + $0xbc] sm:$0xf] %vm1278_vm1, %v1197_v63 }
 0x117   : > { %v1027_v0 = vpop.f32.mrf.mxu2  ;;  %v1107_v1 = vpop.f32.mrf.mxu3 }
 0x118   : > { %v1229_v2 = vpack.c.bf16 %v1027_v0, %v1027_v0  ;;  %v1261_v3 = vpack.c.bf16 %v1107_v1, %v1107_v1  ;;  %v870_v4 = vpop.f32.mrf.mxu0  ;;  %v950_v5 = vpop.f32.mrf.mxu1 }
 0x119   : > { %v1166_v6 = vpack.c.bf16 %v870_v4, %v870_v4  ;;  %v1198_v7 = vpack.c.bf16 %v950_v5, %v950_v5 }
 0x11a   : > { %1358 = vst.msk [vmem:[%s2022_s26 + $0x13c] sm:$0xf] %vm1278_vm1, %v1229_v2 }
 0x11b   : > { %1390 = vst.msk [vmem:[%s2022_s26 + $0x1bc] sm:$0xf] %vm1278_vm1, %v1261_v3 }
 0x11c   : > { %1295 = vst.msk [vmem:[%s2022_s26 + $0x40] sm:$0xf] %vm1278_vm1, %v1166_v6 }
 0x11d   : > { %1327 = vst.msk [vmem:[%s2022_s26 + $0xc0] sm:$0xf] %vm1278_vm1, %v1198_v7 }
 0x11f   : > { %v1030_v8 = vpop.f32.mrf.mxu2  ;;  %v1110_v9 = vpop.f32.mrf.mxu3 }
 0x120   : > { %v1230_v10 = vpack.c.bf16 %v1030_v8, %v1030_v8  ;;  %v1262_v11 = vpack.c.bf16 %v1110_v9, %v1110_v9  ;;  %v872_v12 = vpop.f32.mrf.mxu0  ;;  %v952_v13 = vpop.f32.mrf.mxu1 }
 0x121   : > { %v1167_v14 = vpack.c.bf16 %v872_v12, %v872_v12  ;;  %v1199_v15 = vpack.c.bf16 %v952_v13, %v952_v13 }
 0x122   : > { %1359 = vst.msk [vmem:[%s2022_s26 + $0x140] sm:$0xf] %vm1278_vm1, %v1230_v10 }
 0x123   : > { %1391 = vst.msk [vmem:[%s2022_s26 + $0x1c0] sm:$0xf] %vm1278_vm1, %v1262_v11 }
 0x124   : > { %1296 = vst.msk [vmem:[%s2022_s26 + $0x44] sm:$0xf] %vm1278_vm1, %v1167_v14 }
 0x125   : > { %1328 = vst.msk [vmem:[%s2022_s26 + $0xc4] sm:$0xf] %vm1278_vm1, %v1199_v15 }
 0x127   : > { %v1032_v16 = vpop.f32.mrf.mxu2  ;;  %v1112_v17 = vpop.f32.mrf.mxu3 }
 0x128   : > { %v1231_v18 = vpack.c.bf16 %v1032_v16, %v1032_v16  ;;  %v1263_v19 = vpack.c.bf16 %v1112_v17, %v1112_v17  ;;  %v875_v20 = vpop.f32.mrf.mxu0  ;;  %v955_v21 = vpop.f32.mrf.mxu1 }
 0x129   : > { %v1168_v22 = vpack.c.bf16 %v875_v20, %v875_v20  ;;  %v1200_v23 = vpack.c.bf16 %v955_v21, %v955_v21 }
 0x12a   : > { %1360 = vst.msk [vmem:[%s2022_s26 + $0x144] sm:$0xf] %vm1278_vm1, %v1231_v18 }
 0x12b   : > { %1392 = vst.msk [vmem:[%s2022_s26 + $0x1c4] sm:$0xf] %vm1278_vm1, %v1263_v19 }
 0x12c   : > { %1297 = vst.msk [vmem:[%s2022_s26 + $0x48] sm:$0xf] %vm1278_vm1, %v1168_v22 }
 0x12d   : > { %1329 = vst.msk [vmem:[%s2022_s26 + $0xc8] sm:$0xf] %vm1278_vm1, %v1200_v23 }
 0x12f   : > { %v1035_v24 = vpop.f32.mrf.mxu2  ;;  %v1115_v25 = vpop.f32.mrf.mxu3 }
 0x130   : > { %v1232_v26 = vpack.c.bf16 %v1035_v24, %v1035_v24  ;;  %v1264_v27 = vpack.c.bf16 %v1115_v25, %v1115_v25  ;;  %v877_v28 = vpop.f32.mrf.mxu0  ;;  %v957_v29 = vpop.f32.mrf.mxu1 }
 0x131   : > { %v1169_v30 = vpack.c.bf16 %v877_v28, %v877_v28  ;;  %v1201_v31 = vpack.c.bf16 %v957_v29, %v957_v29 }
 0x132   : > { %1361 = vst.msk [vmem:[%s2022_s26 + $0x148] sm:$0xf] %vm1278_vm1, %v1232_v26 }
 0x133   : > { %1393 = vst.msk [vmem:[%s2022_s26 + $0x1c8] sm:$0xf] %vm1278_vm1, %v1264_v27 }
 0x134   : > { %1298 = vst.msk [vmem:[%s2022_s26 + $0x4c] sm:$0xf] %vm1278_vm1, %v1169_v30 }
 0x135   : > { %1330 = vst.msk [vmem:[%s2022_s26 + $0xcc] sm:$0xf] %vm1278_vm1, %v1201_v31 }
 0x137   : > { %v1037_v32 = vpop.f32.mrf.mxu2  ;;  %v1117_v33 = vpop.f32.mrf.mxu3 }
 0x138   : > { %v1233_v34 = vpack.c.bf16 %v1037_v32, %v1037_v32  ;;  %v1265_v35 = vpack.c.bf16 %v1117_v33, %v1117_v33  ;;  %v880_v36 = vpop.f32.mrf.mxu0  ;;  %v960_v37 = vpop.f32.mrf.mxu1 }
 0x139   : > { %v1170_v38 = vpack.c.bf16 %v880_v36, %v880_v36  ;;  %v1202_v39 = vpack.c.bf16 %v960_v37, %v960_v37 }
 0x13a   : > { %1362 = vst.msk [vmem:[%s2022_s26 + $0x14c] sm:$0xf] %vm1278_vm1, %v1233_v34 }
 0x13b   : > { %1394 = vst.msk [vmem:[%s2022_s26 + $0x1cc] sm:$0xf] %vm1278_vm1, %v1265_v35 }
 0x13c   : > { %1299 = vst.msk [vmem:[%s2022_s26 + $0x50] sm:$0xf] %vm1278_vm1, %v1170_v38 }
 0x13d   : > { %1331 = vst.msk [vmem:[%s2022_s26 + $0xd0] sm:$0xf] %vm1278_vm1, %v1202_v39 }
 0x13f   : > { %v1040_v40 = vpop.f32.mrf.mxu2  ;;  %v1120_v41 = vpop.f32.mrf.mxu3 }
 0x140   : > { %v1234_v42 = vpack.c.bf16 %v1040_v40, %v1040_v40  ;;  %v1266_v43 = vpack.c.bf16 %v1120_v41, %v1120_v41  ;;  %v882_v44 = vpop.f32.mrf.mxu0  ;;  %v962_v45 = vpop.f32.mrf.mxu1 }
 0x141   : > { %v1171_v46 = vpack.c.bf16 %v882_v44, %v882_v44  ;;  %v1203_v47 = vpack.c.bf16 %v962_v45, %v962_v45 }
 0x142   : > { %1363 = vst.msk [vmem:[%s2022_s26 + $0x150] sm:$0xf] %vm1278_vm1, %v1234_v42 }
 0x143   : > { %1395 = vst.msk [vmem:[%s2022_s26 + $0x1d0] sm:$0xf] %vm1278_vm1, %v1266_v43 }
 0x144   : > { %1300 = vst.msk [vmem:[%s2022_s26 + $0x54] sm:$0xf] %vm1278_vm1, %v1171_v46 }
 0x145   : > { %1332 = vst.msk [vmem:[%s2022_s26 + $0xd4] sm:$0xf] %vm1278_vm1, %v1203_v47 }
 0x147   : > { %v1042_v48 = vpop.f32.mrf.mxu2  ;;  %v1122_v49 = vpop.f32.mrf.mxu3 }
 0x148   : > { %v1235_v50 = vpack.c.bf16 %v1042_v48, %v1042_v48  ;;  %v1267_v51 = vpack.c.bf16 %v1122_v49, %v1122_v49  ;;  %v885_v52 = vpop.f32.mrf.mxu0  ;;  %v965_v53 = vpop.f32.mrf.mxu1 }
 0x149   : > { %v1172_v54 = vpack.c.bf16 %v885_v52, %v885_v52  ;;  %v1204_v55 = vpack.c.bf16 %v965_v53, %v965_v53 }
 0x14a   : > { %1364 = vst.msk [vmem:[%s2022_s26 + $0x154] sm:$0xf] %vm1278_vm1, %v1235_v50 }
 0x14b   : > { %1396 = vst.msk [vmem:[%s2022_s26 + $0x1d4] sm:$0xf] %vm1278_vm1, %v1267_v51 }
 0x14c   : > { %1301 = vst.msk [vmem:[%s2022_s26 + $0x58] sm:$0xf] %vm1278_vm1, %v1172_v54 }
 0x14d   : > { %1333 = vst.msk [vmem:[%s2022_s26 + $0xd8] sm:$0xf] %vm1278_vm1, %v1204_v55 }
 0x14f   : > { %v1045_v56 = vpop.f32.mrf.mxu2  ;;  %v1125_v57 = vpop.f32.mrf.mxu3 }
 0x150   : > { %v1236_v58 = vpack.c.bf16 %v1045_v56, %v1045_v56  ;;  %v1268_v59 = vpack.c.bf16 %v1125_v57, %v1125_v57  ;;  %v887_v60 = vpop.f32.mrf.mxu0  ;;  %v967_v61 = vpop.f32.mrf.mxu1 }
 0x151   : > { %v1173_v62 = vpack.c.bf16 %v887_v60, %v887_v60  ;;  %v1205_v63 = vpack.c.bf16 %v967_v61, %v967_v61 }
 0x152   : > { %1365 = vst.msk [vmem:[%s2022_s26 + $0x158] sm:$0xf] %vm1278_vm1, %v1236_v58 }
 0x153   : > { %1397 = vst.msk [vmem:[%s2022_s26 + $0x1d8] sm:$0xf] %vm1278_vm1, %v1268_v59 }
 0x154   : > { %1302 = vst.msk [vmem:[%s2022_s26 + $0x5c] sm:$0xf] %vm1278_vm1, %v1173_v62 }
 0x155   : > { %1334 = vst.msk [vmem:[%s2022_s26 + $0xdc] sm:$0xf] %vm1278_vm1, %v1205_v63 }
 0x157   : > { %v1047_v0 = vpop.f32.mrf.mxu2  ;;  %v1127_v1 = vpop.f32.mrf.mxu3 }
 0x158   : > { %v1237_v2 = vpack.c.bf16 %v1047_v0, %v1047_v0  ;;  %v1269_v3 = vpack.c.bf16 %v1127_v1, %v1127_v1  ;;  %v890_v4 = vpop.f32.mrf.mxu0  ;;  %v970_v5 = vpop.f32.mrf.mxu1 }
 0x159   : > { %v1174_v6 = vpack.c.bf16 %v890_v4, %v890_v4  ;;  %v1206_v7 = vpack.c.bf16 %v970_v5, %v970_v5 }
 0x15a   : > { %1366 = vst.msk [vmem:[%s2022_s26 + $0x15c] sm:$0xf] %vm1278_vm1, %v1237_v2 }
 0x15b   : > { %1398 = vst.msk [vmem:[%s2022_s26 + $0x1dc] sm:$0xf] %vm1278_vm1, %v1269_v3 }
 0x15c   : > { %1303 = vst.msk [vmem:[%s2022_s26 + $0x60] sm:$0xf] %vm1278_vm1, %v1174_v6 }
 0x15d   : > { %1335 = vst.msk [vmem:[%s2022_s26 + $0xe0] sm:$0xf] %vm1278_vm1, %v1206_v7 }
 0x15f   : > { %v1050_v8 = vpop.f32.mrf.mxu2  ;;  %v1130_v9 = vpop.f32.mrf.mxu3 }
 0x160   : > { %v1238_v10 = vpack.c.bf16 %v1050_v8, %v1050_v8  ;;  %v1270_v11 = vpack.c.bf16 %v1130_v9, %v1130_v9  ;;  %v892_v12 = vpop.f32.mrf.mxu0  ;;  %v972_v13 = vpop.f32.mrf.mxu1 }
 0x161   : > { %v1175_v14 = vpack.c.bf16 %v892_v12, %v892_v12  ;;  %v1207_v15 = vpack.c.bf16 %v972_v13, %v972_v13 }
 0x162   : > { %1367 = vst.msk [vmem:[%s2022_s26 + $0x160] sm:$0xf] %vm1278_vm1, %v1238_v10 }
 0x163   : > { %1399 = vst.msk [vmem:[%s2022_s26 + $0x1e0] sm:$0xf] %vm1278_vm1, %v1270_v11 }
 0x164   : > { %1304 = vst.msk [vmem:[%s2022_s26 + $0x64] sm:$0xf] %vm1278_vm1, %v1175_v14 }
 0x165   : > { %1336 = vst.msk [vmem:[%s2022_s26 + $0xe4] sm:$0xf] %vm1278_vm1, %v1207_v15 }
 0x167   : > { %v1052_v16 = vpop.f32.mrf.mxu2  ;;  %v1132_v17 = vpop.f32.mrf.mxu3 }
 0x168   : > { %v1239_v18 = vpack.c.bf16 %v1052_v16, %v1052_v16  ;;  %v1271_v19 = vpack.c.bf16 %v1132_v17, %v1132_v17  ;;  %v895_v20 = vpop.f32.mrf.mxu0  ;;  %v975_v21 = vpop.f32.mrf.mxu1 }
 0x169   : > { %v1176_v22 = vpack.c.bf16 %v895_v20, %v895_v20  ;;  %v1208_v23 = vpack.c.bf16 %v975_v21, %v975_v21 }
 0x16a   : > { %1368 = vst.msk [vmem:[%s2022_s26 + $0x164] sm:$0xf] %vm1278_vm1, %v1239_v18 }
 0x16b   : > { %1400 = vst.msk [vmem:[%s2022_s26 + $0x1e4] sm:$0xf] %vm1278_vm1, %v1271_v19 }
 0x16c   : > { %1305 = vst.msk [vmem:[%s2022_s26 + $0x68] sm:$0xf] %vm1278_vm1, %v1176_v22 }
 0x16d   : > { %1337 = vst.msk [vmem:[%s2022_s26 + $0xe8] sm:$0xf] %vm1278_vm1, %v1208_v23 }
 0x16f   : > { %v1055_v24 = vpop.f32.mrf.mxu2  ;;  %v1135_v25 = vpop.f32.mrf.mxu3 }
 0x170   : > { %v1240_v26 = vpack.c.bf16 %v1055_v24, %v1055_v24  ;;  %v1272_v27 = vpack.c.bf16 %v1135_v25, %v1135_v25  ;;  %v897_v28 = vpop.f32.mrf.mxu0  ;;  %v977_v29 = vpop.f32.mrf.mxu1 }
 0x171   : > { %v1177_v30 = vpack.c.bf16 %v897_v28, %v897_v28  ;;  %v1209_v31 = vpack.c.bf16 %v977_v29, %v977_v29 }
 0x172   : > { %1369 = vst.msk [vmem:[%s2022_s26 + $0x168] sm:$0xf] %vm1278_vm1, %v1240_v26 }
 0x173   : > { %1401 = vst.msk [vmem:[%s2022_s26 + $0x1e8] sm:$0xf] %vm1278_vm1, %v1272_v27 }
 0x174   : > { %1306 = vst.msk [vmem:[%s2022_s26 + $0x6c] sm:$0xf] %vm1278_vm1, %v1177_v30 }
 0x175   : > { %1338 = vst.msk [vmem:[%s2022_s26 + $0xec] sm:$0xf] %vm1278_vm1, %v1209_v31 }
 0x177   : > { %v1057_v32 = vpop.f32.mrf.mxu2  ;;  %v1137_v33 = vpop.f32.mrf.mxu3 }
 0x178   : > { %v1241_v34 = vpack.c.bf16 %v1057_v32, %v1057_v32  ;;  %v1273_v35 = vpack.c.bf16 %v1137_v33, %v1137_v33  ;;  %v900_v36 = vpop.f32.mrf.mxu0  ;;  %v980_v37 = vpop.f32.mrf.mxu1 }
 0x179   : > { %v1178_v38 = vpack.c.bf16 %v900_v36, %v900_v36  ;;  %v1210_v39 = vpack.c.bf16 %v980_v37, %v980_v37 }
 0x17a   : > { %1370 = vst.msk [vmem:[%s2022_s26 + $0x16c] sm:$0xf] %vm1278_vm1, %v1241_v34 }
 0x17b   : > { %1402 = vst.msk [vmem:[%s2022_s26 + $0x1ec] sm:$0xf] %vm1278_vm1, %v1273_v35 }
 0x17c   : > { %1307 = vst.msk [vmem:[%s2022_s26 + $0x70] sm:$0xf] %vm1278_vm1, %v1178_v38 }
 0x17d   : > { %1339 = vst.msk [vmem:[%s2022_s26 + $0xf0] sm:$0xf] %vm1278_vm1, %v1210_v39 }
 0x17f   : > { %v1060_v40 = vpop.f32.mrf.mxu2  ;;  %v1140_v41 = vpop.f32.mrf.mxu3 }
 0x180   : > { %v1242_v42 = vpack.c.bf16 %v1060_v40, %v1060_v40  ;;  %v1274_v43 = vpack.c.bf16 %v1140_v41, %v1140_v41  ;;  %v902_v44 = vpop.f32.mrf.mxu0  ;;  %v982_v45 = vpop.f32.mrf.mxu1 }
 0x181   : > { %v1179_v46 = vpack.c.bf16 %v902_v44, %v902_v44  ;;  %v1211_v47 = vpack.c.bf16 %v982_v45, %v982_v45 }
 0x182   : > { %1371 = vst.msk [vmem:[%s2022_s26 + $0x170] sm:$0xf] %vm1278_vm1, %v1242_v42 }
 0x183   : > { %1403 = vst.msk [vmem:[%s2022_s26 + $0x1f0] sm:$0xf] %vm1278_vm1, %v1274_v43 }
 0x184   : > { %1308 = vst.msk [vmem:[%s2022_s26 + $0x74] sm:$0xf] %vm1278_vm1, %v1179_v46 }
 0x185   : > { %1340 = vst.msk [vmem:[%s2022_s26 + $0xf4] sm:$0xf] %vm1278_vm1, %v1211_v47 }
 0x187   : > { %v1062_v48 = vpop.f32.mrf.mxu2  ;;  %v1142_v49 = vpop.f32.mrf.mxu3 }
 0x188   : > { %v1243_v50 = vpack.c.bf16 %v1062_v48, %v1062_v48  ;;  %v1275_v51 = vpack.c.bf16 %v1142_v49, %v1142_v49  ;;  %v905_v52 = vpop.f32.mrf.mxu0  ;;  %v985_v53 = vpop.f32.mrf.mxu1 }
 0x189   : > { %v1180_v54 = vpack.c.bf16 %v905_v52, %v905_v52  ;;  %v1212_v55 = vpack.c.bf16 %v985_v53, %v985_v53 }
 0x18a   : > { %1372 = vst.msk [vmem:[%s2022_s26 + $0x174] sm:$0xf] %vm1278_vm1, %v1243_v50 }
 0x18b   : > { %1404 = vst.msk [vmem:[%s2022_s26 + $0x1f4] sm:$0xf] %vm1278_vm1, %v1275_v51 }
 0x18c   : > { %1309 = vst.msk [vmem:[%s2022_s26 + $0x78] sm:$0xf] %vm1278_vm1, %v1180_v54 }
 0x18d   : > { %1341 = vst.msk [vmem:[%s2022_s26 + $0xf8] sm:$0xf] %vm1278_vm1, %v1212_v55 }
 0x18f   : > { %v1065_v56 = vpop.f32.mrf.mxu2  ;;  %v1145_v57 = vpop.f32.mrf.mxu3 }
 0x190   : > { %v1244_v58 = vpack.c.bf16 %v1065_v56, %v1065_v56  ;;  %v1276_v59 = vpack.c.bf16 %v1145_v57, %v1145_v57  ;;  %v907_v60 = vpop.f32.mrf.mxu0  ;;  %v987_v61 = vpop.f32.mrf.mxu1 }
 0x191   : > { %v1181_v62 = vpack.c.bf16 %v907_v60, %v907_v60  ;;  %v1213_v63 = vpack.c.bf16 %v987_v61, %v987_v61 }
 0x192   : > { %1373 = vst.msk [vmem:[%s2022_s26 + $0x178] sm:$0xf] %vm1278_vm1, %v1244_v58 }
 0x193   : > { %1405 = vst.msk [vmem:[%s2022_s26 + $0x1f8] sm:$0xf] %vm1278_vm1, %v1276_v59 }
 0x194   : > { %1310 = vst.msk [vmem:[%s2022_s26 + $0x7c] sm:$0xf] %vm1278_vm1, %v1181_v62 }
 0x195   : > { %1342 = vst.msk [vmem:[%s2022_s26 + $0xfc] sm:$0xf] %vm1278_vm1, %v1213_v63 }
 0x197   : > { %v1067_v0 = vpop.f32.mrf.mxu2  ;;  %v1147_v1 = vpop.f32.mrf.mxu3 }
 0x198   : > { %v1245_v2 = vpack.c.bf16 %v1067_v0, %v1067_v0  ;;  %v1277_v3 = vpack.c.bf16 %v1147_v1, %v1147_v1 }
 0x19a   : > { %1374 = vst.msk [vmem:[%s2022_s26 + $0x17c] sm:$0xf] %vm1278_vm1, %v1245_v2 }
 0x19b   : > { %1406 = vst.msk [vmem:[%s2022_s26 + $0x1fc] sm:$0xf] %vm1278_vm1, %v1277_v3 }
 0x19c PF: > { %s12_s9 = sadd.s32 1, %s1904_s9  }
 0x19d   : > { %p9_p4 = scmp.ge.s32.totalorder %s12_s9, 4  }
 0x19f   :  { %11 = sbr.rel (!%p9_p4) target bundleno = 1 (0x1), region = 58 }

</bundles_post_ra>
